<compile_context>
chip_gen: v7x
topology: tpu7x:2x2x1
jax: 0.10.0
libtpu: 0.0.40
codegen_flags: <defaults>
</compile_context>

<pallas_src>
import jax
import jax.numpy as jnp
from jax.experimental import pallas as pl
from jax.experimental.pallas import tpu as pltpu


def classifier_kernel(x_ref, w1t_ref, b1_ref, w2_ref, b2_ref, o_ref):
    # x_ref  : (TB, cols)  bf16  -- contiguous batch tile, pipelined
    # w1t_ref: (cols, H)   bf16  -- max-norm-constrained W1, pre-transposed, resident
    # b1_ref : (1, H)      f32   -- resident
    # w2_ref : (1, H)      f32   -- resident (W2 as a row)
    # b2_ref : (1,)        f32   -- scalar in SMEM
    # o_ref  : (TB, 1)     f32

    # layer 1 on the MXU, f32 accumulation
    h = jnp.dot(x_ref[...], w1t_ref[...], preferred_element_type=jnp.float32)
    h = jnp.maximum(h + b1_ref[...], 0.0)

    # TODO(synk): nn.Dropout(0.1) is identity in eval mode; training-mode dropout would
    # need pltpu.prng_seed / stateful_bernoulli and cannot match torch's RNG stream.

    # layer 2 (width 1): VPU multiply + lane reduce in f32
    logits = jnp.sum(h * w2_ref[...], axis=-1, keepdims=True) + b2_ref[0]
    o_ref[...] = jax.nn.sigmoid(logits)


def _apply_maxnorm(w1, weight_constraint=2.0):
    """PyTorch forward's in-place max-norm constraint on layer.weight (idempotent)."""
    norm = jnp.sqrt(jnp.sum(w1 * w1, axis=0, keepdims=True))
    norm = jnp.maximum(norm, weight_constraint / 2.0)   # .clamp(min=wc/2)
    desired = jnp.minimum(norm, weight_constraint)      # .clamp(max=wc)
    return w1 * (desired / norm)


def _round_up(n, m):
    return m * ((n + m - 1) // m)


def classifier_forward(x, w1, b1, w2, b2, *, weight_constraint=2.0,
                       stream_dtype=jnp.bfloat16):
    """x: (B, cols); w1: (H, cols); b1: (1, H); w2: (1, H); b2: (1, 1).  Returns (B, 1) f32."""
    B, cols = x.shape
    H = w1.shape[0]

    # ---- hoisted parameter prep (tiny, pure JAX, fused by XLA) ----
    w1c = _apply_maxnorm(w1.astype(jnp.float32), weight_constraint)       # (H, cols)
    w1t = w1c.T.astype(stream_dtype)                                      # (cols, H) resident
    b1_row = b1.astype(jnp.float32).reshape(1, H)                         # (1, H)
    w2_row = w2.astype(jnp.float32).reshape(1, H)                         # (1, H)
    b2_s = b2.astype(jnp.float32).reshape(1)                              # (1,) SMEM scalar

    # ---- batch tiling: big batch-sized tile; keep >=2 grid steps when batch allows (v7x) ----
    B_up = _round_up(B, 128)
    TB = min(B_up, 4096)
    if B_up // TB < 2 and B_up >= 256:          # don't collapse the grid to 1 step on v7x
        TB = max(128, ((B_up // 2) // 128) * 128)
    B_pad = _round_up(B_up, TB)
    num_steps = B_pad // TB

    # stream x in bf16; cast is skipped if x already lives in bf16 upstream
    x_in = x if x.dtype == stream_dtype else x.astype(stream_dtype)
    if B_pad != B:
        x_in = jnp.pad(x_in, ((0, B_pad - B), (0, 0)))

    out = pl.pallas_call(
        classifier_kernel,
        out_shape=jax.ShapeDtypeStruct((B_pad, 1), jnp.float32),
        grid=(num_steps,),
        in_specs=[
            pl.BlockSpec((TB, cols), lambda i: (i, 0)),             # x tile (contiguous rows)
            pl.BlockSpec((cols, H), lambda i: (0, 0)),              # W1^T resident
            pl.BlockSpec((1, H), lambda i: (0, 0)),                 # b1 resident
            pl.BlockSpec((1, H), lambda i: (0, 0)),                 # W2 row resident
            pl.BlockSpec(memory_space=pltpu.MemorySpace.SMEM),      # b2 scalar
        ],
        out_specs=pl.BlockSpec((TB, 1), lambda i: (i, 0)),
        compiler_params=pltpu.CompilerParams(
            dimension_semantics=("parallel",),
        ),
    )(x_in, w1t, b1_row, w2_row, b2_s)

    return out[:B]                                                   # padded tail sliced off


def init_params(key, cols, n_neurons):
    """Deterministic init mirroring the module's __init__ (kaiming_uniform_ weights,
    PyTorch-default uniform biases)."""
    k1, k2, k3, k4 = jax.random.split(key, 4)

    bound1 = (6.0 / cols) ** 0.5
    w1 = jax.random.uniform(k1, (n_neurons, cols), jnp.float32, -bound1, bound1)
    bb1 = 1.0 / (cols ** 0.5)
    b1 = jax.random.uniform(k2, (1, n_neurons), jnp.float32, -bb1, bb1)

    bound2 = (6.0 / n_neurons) ** 0.5
    w2 = jax.random.uniform(k3, (1, n_neurons), jnp.float32, -bound2, bound2)
    bb2 = 1.0 / (n_neurons ** 0.5)
    b2 = jax.random.uniform(k4, (1, 1), jnp.float32, -bb2, bb2)

    return w1, b1, w2, b2


if __name__ == "__main__":
    key = jax.random.PRNGKey(0)
    kx, kp = jax.random.split(key)

    batch = 256
    cols = 8        # number of feature columns in the (synthetic) dataset
    n_neurons = 12  # default hidden width from the module

    x = jax.random.normal(kx, (batch, cols), jnp.float32)
    w1, b1, w2, b2 = init_params(kp, cols, n_neurons)

    out = classifier_forward(x, w1, b1, w2, b2)
    out = jax.block_until_ready(out)

    # ---- pure-JAX reference (emulating the bf16-rounded streamed inputs, f32 accumulate) ----
    w1c = _apply_maxnorm(w1, 2.0)
    x_bf = x.astype(jnp.bfloat16).astype(jnp.float32)
    w1c_bf = w1c.astype(jnp.bfloat16).astype(jnp.float32)
    h_ref = jnp.maximum(x_bf @ w1c_bf.T + b1, 0.0)
    y_ref = jax.nn.sigmoid(jnp.sum(h_ref * w2, axis=-1, keepdims=True) + b2)

    assert out.shape == (batch, 1)
    assert jnp.allclose(out, y_ref, atol=1e-4), "mismatch vs reference"

    print("KERNEL_OK")
</pallas_src>

<mosaic_0001>
module attributes {stable_mosaic.version = 11 : i64} {
  func.func @classifier_kernel(%arg0: i32, %arg1: memref<128x8xbf16, #tpu.memory_space<vmem>>, %arg2: memref<8x12xbf16, #tpu.memory_space<vmem>>, %arg3: memref<1x12xf32, #tpu.memory_space<vmem>>, %arg4: memref<1x12xf32, #tpu.memory_space<vmem>>, %arg5: memref<1xf32, #tpu.memory_space<smem>>, %arg6: memref<128x1xf32, #tpu.memory_space<vmem>>) attributes {dimension_semantics = [#tpu.dimension_semantics<parallel>], iteration_bounds = array<i64: 2>, scalar_prefetch = 0 : i64, scratch_operands = 0 : i64, tpu.core_type = #tpu.core_type<tc>, window_params = [{transform_indices = @transform_0, window_bounds = array<i64: 128, 8>}, {pipeline_mode = #tpu.pipeline_mode<synchronous>, transform_indices = @transform_1, window_bounds = array<i64: 8, 12>}, {pipeline_mode = #tpu.pipeline_mode<synchronous>, transform_indices = @transform_2, window_bounds = array<i64: 1, 12>}, {pipeline_mode = #tpu.pipeline_mode<synchronous>, transform_indices = @transform_3, window_bounds = array<i64: 1, 12>}, {transform_indices = @transform_4, window_bounds = array<i64: 1>}, {transform_indices = @transform_5, window_bounds = array<i64: 128, 1>}]} {
    %c0 = arith.constant 0 : index
    %c0_0 = arith.constant 0 : index
    %0 = vector.load %arg1[%c0, %c0_0] : memref<128x8xbf16, #tpu.memory_space<vmem>>, vector<128x8xbf16>
    %c0_1 = arith.constant 0 : index
    %c0_2 = arith.constant 0 : index
    %1 = vector.load %arg2[%c0_1, %c0_2] : memref<8x12xbf16, #tpu.memory_space<vmem>>, vector<8x12xbf16>
    %cst = arith.constant dense<0.000000e+00> : vector<128x12xf32>
    %2 = tpu.matmul %0, %1, %cst {dimension_numbers = #tpu.dot_dimension_numbers<[1], [0], [0], [1], [0, 0, 1, 1], [], []>} : vector<128x8xbf16>, vector<8x12xbf16>, vector<128x12xf32> -> vector<128x12xf32>
    %c0_3 = arith.constant 0 : index
    %c0_4 = arith.constant 0 : index
    %3 = vector.load %arg3[%c0_3, %c0_4] : memref<1x12xf32, #tpu.memory_space<vmem>>, vector<1x12xf32>
    %4 = vector.broadcast %3 : vector<1x12xf32> to vector<128x12xf32>
    %5 = arith.addf %2, %4 : vector<128x12xf32>
    %cst_5 = arith.constant 0.000000e+00 : f32
    %6 = vector.broadcast %cst_5 : f32 to vector<128x12xf32>
    %7 = arith.maximumf %5, %6 : vector<128x12xf32>
    %c0_6 = arith.constant 0 : index
    %c0_7 = arith.constant 0 : index
    %8 = vector.load %arg4[%c0_6, %c0_7] : memref<1x12xf32, #tpu.memory_space<vmem>>, vector<1x12xf32>
    %9 = vector.broadcast %8 : vector<1x12xf32> to vector<128x12xf32>
    %10 = arith.mulf %7, %9 : vector<128x12xf32>
    %cst_8 = arith.constant dense<0.000000e+00> : vector<128xf32>
    %11 = vector.multi_reduction <add>, %10, %cst_8 [1] : vector<128x12xf32> to vector<128xf32>
    %12 = vector.shape_cast %11 : vector<128xf32> to vector<128x1xf32>
    %c0_9 = arith.constant 0 : index
    %13 = memref.load %arg5[%c0_9] : memref<1xf32, #tpu.memory_space<smem>>
    %14 = vector.broadcast %13 : f32 to vector<128x1xf32>
    %15 = arith.addf %12, %14 : vector<128x1xf32>
    %16 = arith.negf %15 : vector<128x1xf32>
    %17 = math.exp %16 : vector<128x1xf32>
    %cst_10 = arith.constant 1.000000e+00 : f32
    %18 = vector.broadcast %cst_10 : f32 to vector<128x1xf32>
    %19 = arith.addf %18, %17 : vector<128x1xf32>
    %20 = arith.divf %18, %19 : vector<128x1xf32>
    %c0_11 = arith.constant 0 : index
    %c0_12 = arith.constant 0 : index
    %21 = vector.load %arg6[%c0_11, %c0_12] : memref<128x1xf32, #tpu.memory_space<vmem>>, vector<128x1xf32>
    tpu.vector_store %arg6[%c0_11, %c0_12], %20 {strides = array<i32>} : memref<128x1xf32, #tpu.memory_space<vmem>>, vector<128x1xf32>,
    return
  }
  func.func @transform_0(%arg0: i32) -> (i32, i32) {
    %c0_i32 = arith.constant 0 : i32
    %c0_i32_0 = arith.constant 0 : i32
    return %arg0, %c0_i32 : i32, i32
  }
  func.func @transform_1(%arg0: i32) -> (i32, i32) {
    %c0_i32 = arith.constant 0 : i32
    %c0_i32_0 = arith.constant 0 : i32
    %c0_i32_1 = arith.constant 0 : i32
    return %c0_i32, %c0_i32_0 : i32, i32
  }
  func.func @transform_2(%arg0: i32) -> (i32, i32) {
    %c0_i32 = arith.constant 0 : i32
    %c0_i32_0 = arith.constant 0 : i32
    %c0_i32_1 = arith.constant 0 : i32
    return %c0_i32, %c0_i32_0 : i32, i32
  }
  func.func @transform_3(%arg0: i32) -> (i32, i32) {
    %c0_i32 = arith.constant 0 : i32
    %c0_i32_0 = arith.constant 0 : i32
    %c0_i32_1 = arith.constant 0 : i32
    return %c0_i32, %c0_i32_0 : i32, i32
  }
  func.func @transform_4(%arg0: i32) -> i32 {
    %c0_i32 = arith.constant 0 : i32
    %c0_i32_0 = arith.constant 0 : i32
    return %c0_i32 : i32
  }
  func.func @transform_5(%arg0: i32) -> (i32, i32) {
    %c0_i32 = arith.constant 0 : i32
    %c0_i32_0 = arith.constant 0 : i32
    return %arg0, %c0_i32 : i32, i32
  }
}

</mosaic_0001>

<bundles_post_ra>
// kernel: tpu_custom_call.1
= control target key start
LH: loop header
LB: loop body
LE: loop exit
PB: predicated region body
PF: predicated region fallthrough
CT: control target
= control target key end

     0   :  { %s892_s20 = smov 0   ;;  %s1034_s0 = inlined_call_operand.vmem [shape: bf16[256,8], index: 0, kind: input, shape index: {}]   ;;  %s1035_s1 = inlined_call_operand.vmem [shape: bf16[8,12], index: 1, kind: input, shape index: {}]   ;;  %s1036_s2 = inlined_call_operand.vmem [shape: f32[1,12], index: 2, kind: input, shape index: {}]   ;;  %s1037_s3 = inlined_call_operand.vmem [shape: f32[1,12], index: 3, kind: input, shape index: {}]   ;;  %s1038_s4 = inlined_call_operand.<no memory space> [shape: f32[1], index: 4, kind: input, shape index: {}]   ;;  %s1039_s5 = inlined_call_operand.vmem [shape: f32[256,1], index: 5, kind: output, shape index: {}]  }
   0x1   :  { %10 = sst [smem:[#allocation2]] %s1038_s4 }
   0x2 LB: > { %s695_s21 = sadd.s32 4294967295, %s857_s20   ;;  %p699_p0 = scmp.ge.s32.totalorder %s857_s20, 1  ;;  %s857_s20 = sphi %s892_s20, %s16_s20  }
   0x3   : > { %p189_p1 = scmp.lt.s32.totalorder %s857_s20, 3 }
   0x5   : > { %p190_p2 = pnand %p699_p0, %p189_p1 }
   0x6   : > { %v246_v0 = vld [vmem:[%s1035_s1] sm:$0xf] (!%p190_p2)  ;;  %vm319_vm0 = vcmask (!%p190_p2), 1043456   ;;  %s700_s4 = sshll.u32 (!%p190_p2), %s695_s21, 4  ;;  %vm294_vm1 = vcmask (!%p190_p2), 64512   ;;  %vm459_vm2 = vcmask (!%p190_p2), 97280  }
   0x7   : > { %193 = sbr.rel (%p190_p2) target bundleno = 440 (0x1b8), region = 40  ;;  %769 = vmatprep.subr.msk.bf16.mxu0 (!%p190_p2), %vm319_vm0, %v246_v0  ;;  %770 = vmatprep.subr.msk.bf16.mxu1 (!%p190_p2), %vm319_vm0, %v246_v0  ;;  %v321_v1 = vsel (!%p190_p2), %vm319_vm0, %v246_v0, 0  ;;  %p218_p3 = scmp.lt.s32.totalorder (!%p190_p2), %s700_s4, 31  ;;  %v920_v10 = vld [vmem:[%s1036_s2] ss:$0 sm:$0xff] (!%p190_p2)  ;;  %vm622_vm3 = vcmask (!%p190_p2), 7168  }
   0x8   : > { %750 = vmatpush3.bf16.msra.mxu0 (!%p190_p2), %v321_v1  ;;  %768 = vmatpush3.bf16.msra.mxu1 (!%p190_p2), %v321_v1  ;;  %v928_v19 = vld [vmem:[%s1037_s3] ss:$0 sm:$0xff] (!%p190_p2)  ;;  %s508_s7 = sld [smem:[#allocation2]] (!%p190_p2) }
   0xe   : > { %s1041_s4 = smov (!%p218_p3, %s700_s4), 31 }
   0xf   : > { %s701_s24 = sshll.u32 %s1041_s4, 2  ;;  %s703_s8 = sshll.u32 %s1041_s4, 3 }
  0x10   : > { %s221_s27 = scalar_lea.vmem %s1034_s0, %s701_s24  ;;  %s994_s11 = scalar_lea.vmem %s1039_s5, %s703_s8 }
  0x11   : > { %v779_v2 = vld [vmem:[%s221_s27] sm:$0xff]   ;;  %v781_v4 = vld [vmem:[%s221_s27 + $0x8] sm:$0xff]   ;;  %v783_v6 = vld [vmem:[%s221_s27 + $0x10] sm:$0xff]  }
  0x12   : > { %v780_v3 = vld [vmem:[%s221_s27 + $0x20] sm:$0xff]   ;;  %751 = vmatprep.mubr.msk.bf16.mxu0 %vm294_vm1, %v779_v2  ;;  %v782_v5 = vld [vmem:[%s221_s27 + $0x28] sm:$0xff]   ;;  %v785_v7 = vld [vmem:[%s221_s27 + $0x30] sm:$0xff]  }
  0x13   : > { %759 = vmatprep.mubr.msk.bf16.mxu1 %vm294_vm1, %v780_v3  ;;  %752 = vmatmul.mubr.msk.bf16.vlgmr.msra.gmra.mrb[0].mxu0 %vm294_vm1, %v781_v4  ;;  %v784_v8 = vld [vmem:[%s221_s27 + $0x18] sm:$0xff]  }
  0x14   : > { %760 = vmatmul.mubr.msk.bf16.vlgmr.msra.gmra.mrb[0].mxu1 %vm294_vm1, %v782_v5  ;;  %755 = vmatprep.mubr.msk.bf16.mxu0 %vm294_vm1, %v783_v6  ;;  %v786_v9 = vld [vmem:[%s221_s27 + $0x38] sm:$0xff]  }
  0x15   : > { %763 = vmatprep.mubr.msk.bf16.mxu1 %vm294_vm1, %v785_v7 }
  0x1b   : > { %756 = vmatmul.mubr.msk.bf16.gmra.mrb[4].mxu0 %vm294_vm1, %v784_v8 }
  0x1c   : > { %764 = vmatmul.mubr.msk.bf16.gmra.mrb[4].mxu1 %vm294_vm1, %v786_v9 }
  0xe6   : > { %v753_v11 = vpop.f32.mrb[0].mxu0 }
  0xe7   : > { %v366_v12 = vadd.f32 %v753_v11, %v920_v10  ;;  %v761_v13 = vpop.f32.mrb[0].mxu1  ;;  %v357_v14 = vpop.f32.mrb[1].mxu0 }
  0xe8   : > { %v398_v15 = vadd.f32 %v761_v13, %v920_v10  ;;  %v358_v16 = vadd.f32 %v920_v10, %v357_v14  ;;  %v389_v17 = vpop.f32.mrb[1].mxu1  ;;  %v754_v18 = vpop.f32.mrb[2].mxu0 }
  0xe9   : > { %v422_v20 = vmax.f32 %v366_v12, 0.0  ;;  %v369_v21 = vadd.f32 %v754_v18, %v920_v10  ;;  %v762_v22 = vpop.f32.mrb[2].mxu1  ;;  %v360_v23 = vpop.f32.mrb[3].mxu0  ;;  %v390_v26 = vadd.f32 %v920_v10, %v389_v17 }
  0xea   : > { %v430_v24 = vmax.f32 %v398_v15, 0.0  ;;  %v420_v25 = vmax.f32 %v358_v16, 0.0  ;;  %v401_v27 = vadd.f32 %v762_v22, %v920_v10  ;;  %v392_v28 = vpop.f32.mrb[3].mxu1  ;;  %v361_v37 = vadd.f32 %v920_v10, %v360_v23 }
  0xeb   : > { %v423_v29 = vmax.f32 %v369_v21, 0.0  ;;  %v445_v30 = vmul.f32 %v928_v19, %v422_v20  ;;  %v393_v33 = vadd.f32 %v920_v10, %v392_v28  ;;  %v428_v36 = vmax.f32 %v390_v26, 0.0 }
  0xec   : > { %v453_v31 = vmul.f32 %v928_v19, %v430_v24  ;;  %v431_v32 = vmax.f32 %v401_v27, 0.0  ;;  %v443_v40 = vmul.f32 %v928_v19, %v420_v25  ;;  %v421_v51 = vmax.f32 %v361_v37, 0.0 }
  0xed   : > { %v466_v34 = vsel %vm459_vm2, %v445_v30, 0.0  ;;  %v446_v35 = vmul.f32 %v928_v19, %v423_v29  ;;  %v429_v45 = vmax.f32 %v393_v33, 0.0  ;;  %v451_v54 = vmul.f32 %v928_v19, %v428_v36 }
  0xee   : > { %v490_v38 = vsel %vm459_vm2, %v453_v31, 0.0  ;;  %467 = vadd.xlane.f32.xlu1 %v466_v34  ;;  %v757_v39 = vpop.f32.mrb[4].mxu0  ;;  %v454_v49 = vmul.f32 %v928_v19, %v431_v32  ;;  %v460_v53 = vsel %vm459_vm2, %v443_v40, 0.0  ;;  %v444_v63 = vmul.f32 %v928_v19, %v421_v51 }
  0xef   : > { %491 = vadd.xlane.f32.xlu0 %v490_v38  ;;  %v373_v41 = vpop.f32.mrb[5].mxu0  ;;  %v765_v42 = vpop.f32.mrb[4].mxu1  ;;  %v469_v46 = vsel %vm459_vm2, %v446_v35, 0.0  ;;  %v382_v52 = vadd.f32 %v757_v39, %v920_v10  ;;  %v452_v59 = vmul.f32 %v928_v19, %v429_v45  ;;  %v484_v62 = vsel %vm459_vm2, %v451_v54, 0.0 }
  0xf0   : > { %v758_v43 = vpop.f32.mrb[6].mxu0  ;;  %v405_v44 = vpop.f32.mrb[5].mxu1  ;;  %v493_v58 = vsel %vm459_vm2, %v454_v49, 0.0  ;;  %v374_v61 = vadd.f32 %v920_v10, %v373_v41  ;;  %v463_v6 = vsel %vm459_vm2, %v444_v63, 0.0  ;;  %v414_v13 = vadd.f32 %v765_v42, %v920_v10 }
  0xf1   : > { %v385_v47 = vadd.f32 %v758_v43, %v920_v10  ;;  %v376_v48 = vpop.f32.mrb[7].mxu0  ;;  %v766_v50 = vpop.f32.mrb[6].mxu1  ;;  %v426_v60 = vmax.f32 %v382_v52, 0.0  ;;  %v487_v1 = vsel %vm459_vm2, %v452_v59, 0.0  ;;  %v406_v5 = vadd.f32 %v920_v10, %v405_v44 }
  0xf2   : > { %470 = vadd.xlane.f32.xlu1 %v469_v46  ;;  %v408_v55 = vpop.f32.mrb[7].mxu1  ;;  %v377_v57 = vadd.f32 %v920_v10, %v376_v48  ;;  %v424_v4 = vmax.f32 %v374_v61, 0.0  ;;  %v417_v8 = vadd.f32 %v766_v50, %v920_v10  ;;  %v434_v21 = vmax.f32 %v414_v13, 0.0 }
  0xf3   : > { %461 = vadd.xlane.f32.xlu0 %v460_v53  ;;  %v427_v56 = vmax.f32 %v385_v47, 0.0  ;;  %v409_v2 = vadd.f32 %v920_v10, %v408_v55  ;;  %v449_v7 = vmul.f32 %v928_v19, %v426_v60  ;;  %v432_v14 = vmax.f32 %v406_v5, 0.0 }
  0xf4   : > { %v425_v0 = vmax.f32 %v377_v57, 0.0  ;;  %v447_v16 = vmul.f32 %v928_v19, %v424_v4  ;;  %v435_v17 = vmax.f32 %v417_v8, 0.0  ;;  %v457_v26 = vmul.f32 %v928_v19, %v434_v21 }
  0xf5   : > { %v450_v3 = vmul.f32 %v928_v19, %v427_v56  ;;  %v433_v9 = vmax.f32 %v409_v2, 0.0  ;;  %v478_v15 = vsel %vm459_vm2, %v449_v7, 0.0  ;;  %v455_v23 = vmul.f32 %v928_v19, %v432_v14 }
  0xf6   : > { %494 = vadd.xlane.f32.xlu1 %v493_v58  ;;  %v448_v12 = vmul.f32 %v928_v19, %v425_v0  ;;  %v472_v22 = vsel %vm459_vm2, %v447_v16, 0.0  ;;  %v458_v24 = vmul.f32 %v928_v19, %v435_v17  ;;  %v502_v28 = vsel %vm459_vm2, %v457_v26, 0.0 }
  0xf7   : > { %485 = vadd.xlane.f32.xlu0 %v484_v62  ;;  %v481_v11 = vsel %vm459_vm2, %v450_v3, 0.0  ;;  %v456_v20 = vmul.f32 %v928_v19, %v433_v9  ;;  %v496_v25 = vsel %vm459_vm2, %v455_v23, 0.0  ;;  %v975_v29 = vstv %s508_s7 }
  0xf8   : > { %v475_v18 = vsel %vm459_vm2, %v448_v12, 0.0  ;;  %v505_v27 = vsel %vm459_vm2, %v458_v24, 0.0 }
  0xf9   : > { %v499_v10 = vsel %vm459_vm2, %v456_v20, 0.0 }
  0xfa   : > { %488 = vadd.xlane.f32.xlu1 %v487_v1 }
  0xfb   : > { %464 = vadd.xlane.f32.xlu0 %v463_v6 }
  0xfe   : > { %482 = vadd.xlane.f32.xlu1 %v481_v11 }
  0xff   : > { %479 = vadd.xlane.f32.xlu0 %v478_v15 }
 0x102   : > { %476 = vadd.xlane.f32.xlu1 %v475_v18 }
 0x103   : > { %473 = vadd.xlane.f32.xlu0 %v472_v22 }
 0x106   : > { %500 = vadd.xlane.f32.xlu1 %v499_v10 }
 0x107   : > { %497 = vadd.xlane.f32.xlu0 %v496_v25 }
 0x10a   : > { %506 = vadd.xlane.f32.xlu1 %v505_v27 }
 0x10b   : > { %503 = vadd.xlane.f32.xlu0 %v502_v28 }
 0x17b   : > { %v468_v30 = vpop.xlane.xlu1 %467 }
 0x17c   : > { %v492_v31 = vpop.xlane.xlu0 %491  ;;  %v512_v32 = vadd.f32 %v975_v29, %v468_v30 }
 0x17d   : > { %v520_v33 = vadd.f32 %v975_v29, %v492_v31 }
 0x17e   : > { %v724_v34 = vmul.f32 -1.442695, %v512_v32 }
 0x17f   : > { %v732_v35 = vmul.f32 -1.442695, %v520_v33  ;;  %v471_v36 = vpop.xlane.xlu1 %470 }
 0x180   : > { %787 = vpow2.f32 %v724_v34  ;;  %v513_v19 = vadd.f32 %v975_v29, %v471_v36  ;;  %v462_v37 = vpop.xlane.xlu0 %461 }
 0x181   : > { %789 = vpow2.f32 %v732_v35  ;;  %v510_v38 = vadd.f32 %v975_v29, %v462_v37 }
 0x182   : > { %v725_v39 = vmul.f32 -1.442695, %v513_v19 }
 0x183   : > { %v722_v40 = vmul.f32 -1.442695, %v510_v38  ;;  %v495_v41 = vpop.xlane.xlu1 %494 }
 0x184   : > { %791 = vpow2.f32 %v725_v39  ;;  %v521_v42 = vadd.f32 %v975_v29, %v495_v41  ;;  %v486_v43 = vpop.xlane.xlu0 %485 }
 0x185   : > { %793 = vpow2.f32 %v722_v40  ;;  %v518_v44 = vadd.f32 %v975_v29, %v486_v43 }
 0x186   : > { %v733_v45 = vmul.f32 -1.442695, %v521_v42 }
 0x187   : > { %v730_v46 = vmul.f32 -1.442695, %v518_v44  ;;  %v489_v47 = vpop.xlane.xlu1 %488 }
 0x188   : > { %795 = vpow2.f32 %v733_v45  ;;  %v519_v48 = vadd.f32 %v975_v29, %v489_v47  ;;  %v465_v49 = vpop.xlane.xlu0 %464 }
 0x189   : > { %797 = vpow2.f32 %v730_v46  ;;  %v511_v50 = vadd.f32 %v975_v29, %v465_v49 }
 0x18a   : > { %v788_v51 = vpop.eup %787  ;;  %v731_v52 = vmul.f32 -1.442695, %v519_v48 }
 0x18b   : > { %v790_v53 = vpop.eup %789  ;;  %v576_v54 = vadd.f32 1.0, %v788_v51  ;;  %v723_v55 = vmul.f32 -1.442695, %v511_v50  ;;  %v483_v56 = vpop.xlane.xlu1 %482 }
 0x18c   : > { %v584_v57 = vadd.f32 1.0, %v790_v53  ;;  %799 = vpow2.f32 %v731_v52  ;;  %v517_v58 = vadd.f32 %v975_v29, %v483_v56  ;;  %v480_v59 = vpop.xlane.xlu0 %479 }
 0x18d   : > { %801 = vrcp.f32 %v576_v54  ;;  %v516_v60 = vadd.f32 %v975_v29, %v480_v59 }
 0x18e   : > { %v792_v61 = vpop.eup %791  ;;  %803 = vrcp.f32 %v584_v57  ;;  %v729_v62 = vmul.f32 -1.442695, %v517_v58 }
 0x18f   : > { %v794_v63 = vpop.eup %793  ;;  %v577_v0 = vadd.f32 1.0, %v792_v61  ;;  %805 = vpow2.f32 %v723_v55  ;;  %v728_v1 = vmul.f32 -1.442695, %v516_v60  ;;  %v477_v2 = vpop.xlane.xlu1 %476 }
 0x190   : > { %v574_v3 = vadd.f32 1.0, %v794_v63  ;;  %807 = vpow2.f32 %v729_v62  ;;  %v515_v4 = vadd.f32 %v975_v29, %v477_v2  ;;  %v474_v5 = vpop.xlane.xlu0 %473 }
 0x191   : > { %809 = vrcp.f32 %v577_v0  ;;  %v514_v6 = vadd.f32 %v975_v29, %v474_v5 }
 0x192   : > { %v796_v7 = vpop.eup %795  ;;  %811 = vrcp.f32 %v574_v3  ;;  %v727_v8 = vmul.f32 -1.442695, %v515_v4 }
 0x193   : > { %v798_v9 = vpop.eup %797  ;;  %v585_v11 = vadd.f32 1.0, %v796_v7  ;;  %813 = vpow2.f32 %v728_v1  ;;  %v726_v12 = vmul.f32 -1.442695, %v514_v6  ;;  %v501_v13 = vpop.xlane.xlu1 %500 }
 0x194   : > { %v582_v14 = vadd.f32 1.0, %v798_v9  ;;  %815 = vpow2.f32 %v727_v8  ;;  %v523_v15 = vadd.f32 %v975_v29, %v501_v13  ;;  %v498_v16 = vpop.xlane.xlu0 %497 }
 0x195   : > { %817 = vrcp.f32 %v585_v11  ;;  %v522_v17 = vadd.f32 %v975_v29, %v498_v16 }
 0x196   : > { %v800_v18 = vpop.eup %799  ;;  %819 = vrcp.f32 %v582_v14  ;;  %v735_v20 = vmul.f32 -1.442695, %v523_v15 }
 0x197   : > { %v802_v21 = vpop.eup %801  ;;  %v583_v22 = vadd.f32 1.0, %v800_v18  ;;  %821 = vpow2.f32 %v726_v12  ;;  %v734_v23 = vmul.f32 -1.442695, %v522_v17  ;;  %v507_v10 = vpop.xlane.xlu1 %506 }
 0x198   : > { %v804_v24 = vpop.eup %803  ;;  %625 = vst.msk [vmem:[%s994_s11 + $0x10] sm:$0xff] %vm622_vm3, %v802_v21  ;;  %823 = vpow2.f32 %v735_v20  ;;  %v525_v25 = vadd.f32 %v975_v29, %v507_v10  ;;  %v504_v26 = vpop.xlane.xlu0 %503 }
 0x199   : > { %v806_v27 = vpop.eup %805  ;;  %633 = vst.msk [vmem:[%s994_s11 + $0x50] sm:$0xff] %vm622_vm3, %v804_v24  ;;  %825 = vrcp.f32 %v583_v22  ;;  %v524_v28 = vadd.f32 %v975_v29, %v504_v26 }
 0x19a   : > { %v808_v30 = vpop.eup %807  ;;  %v575_v31 = vadd.f32 1.0, %v806_v27  ;;  %827 = vpow2.f32 %v734_v23  ;;  %v737_v32 = vmul.f32 -1.442695, %v525_v25 }
 0x19b   : > { %v810_v33 = vpop.eup %809  ;;  %v581_v34 = vadd.f32 1.0, %v808_v30  ;;  %v736_v35 = vmul.f32 -1.442695, %v524_v28 }
 0x19c   : > { %v812_v36 = vpop.eup %811  ;;  %626 = vst.msk [vmem:[%s994_s11 + $0x18] sm:$0xff] %vm622_vm3, %v810_v33  ;;  %829 = vrcp.f32 %v575_v31 }
 0x19d   : > { %v814_v19 = vpop.eup %813  ;;  %623 = vst.msk [vmem:[%s994_s11] sm:$0xff] %vm622_vm3, %v812_v36  ;;  %831 = vrcp.f32 %v581_v34 }
 0x19e   : > { %v816_v37 = vpop.eup %815  ;;  %v580_v38 = vadd.f32 1.0, %v814_v19  ;;  %833 = vpow2.f32 %v737_v32 }
 0x19f   : > { %v818_v29 = vpop.eup %817  ;;  %v579_v39 = vadd.f32 1.0, %v816_v37  ;;  %835 = vpow2.f32 %v736_v35 }
 0x1a0   : > { %v820_v40 = vpop.eup %819  ;;  %634 = vst.msk [vmem:[%s994_s11 + $0x58] sm:$0xff] %vm622_vm3, %v818_v29  ;;  %837 = vrcp.f32 %v580_v38 }
 0x1a1   : > { %v822_v41 = vpop.eup %821  ;;  %631 = vst.msk [vmem:[%s994_s11 + $0x40] sm:$0xff] %vm622_vm3, %v820_v40  ;;  %839 = vrcp.f32 %v579_v39 }
 0x1a2   : > { %v824_v42 = vpop.eup %823  ;;  %v578_v43 = vadd.f32 1.0, %v822_v41 }
 0x1a3   : > { %v826_v44 = vpop.eup %825  ;;  %v587_v45 = vadd.f32 1.0, %v824_v42 }
 0x1a4   : > { %v828_v46 = vpop.eup %827  ;;  %632 = vst.msk [vmem:[%s994_s11 + $0x48] sm:$0xff] %vm622_vm3, %v826_v44  ;;  %841 = vrcp.f32 %v578_v43 }
 0x1a5   : > { %843 = vrcp.f32 %v587_v45  ;;  %v586_v47 = vadd.f32 1.0, %v828_v46 }
 0x1a6   : > { %v830_v48 = vpop.eup %829 }
 0x1a7   : > { %v832_v49 = vpop.eup %831  ;;  %624 = vst.msk [vmem:[%s994_s11 + $0x8] sm:$0xff] %vm622_vm3, %v830_v48  ;;  %845 = vrcp.f32 %v586_v47 }
 0x1a8   : > { %v834_v50 = vpop.eup %833  ;;  %630 = vst.msk [vmem:[%s994_s11 + $0x38] sm:$0xff] %vm622_vm3, %v832_v49 }
 0x1a9   : > { %v836_v51 = vpop.eup %835  ;;  %v589_v52 = vadd.f32 1.0, %v834_v50 }
 0x1aa   : > { %v838_v53 = vpop.eup %837  ;;  %v588_v54 = vadd.f32 1.0, %v836_v51 }
 0x1ab   : > { %v840_v55 = vpop.eup %839  ;;  %629 = vst.msk [vmem:[%s994_s11 + $0x30] sm:$0xff] %vm622_vm3, %v838_v53  ;;  %847 = vrcp.f32 %v589_v52 }
 0x1ac   : > { %628 = vst.msk [vmem:[%s994_s11 + $0x28] sm:$0xff] %vm622_vm3, %v840_v55  ;;  %849 = vrcp.f32 %v588_v54 }
 0x1ae   : > { %v842_v56 = vpop.eup %841 }
 0x1af   : > { %v844_v57 = vpop.eup %843  ;;  %627 = vst.msk [vmem:[%s994_s11 + $0x20] sm:$0xff] %vm622_vm3, %v842_v56 }
 0x1b0   : > { %636 = vst.msk [vmem:[%s994_s11 + $0x68] sm:$0xff] %vm622_vm3, %v844_v57 }
 0x1b1   : > { %v846_v58 = vpop.eup %845 }
 0x1b2   : > { %635 = vst.msk [vmem:[%s994_s11 + $0x60] sm:$0xff] %vm622_vm3, %v846_v58 }
 0x1b5   : > { %v848_v59 = vpop.eup %847 }
 0x1b6   : > { %v850_v60 = vpop.eup %849  ;;  %638 = vst.msk [vmem:[%s994_s11 + $0x78] sm:$0xff] %vm622_vm3, %v848_v59 }
 0x1b7   : > { %637 = vst.msk [vmem:[%s994_s11 + $0x70] sm:$0xff] %vm622_vm3, %v850_v60 }
 0x1b8 PF: > { %s16_s20 = sadd.s32 1, %s857_s20  }
 0x1b9   : > { %p13_p4 = scmp.ge.s32.totalorder %s16_s20, 4  }
 0x1bb   :  { %15 = sbr.rel (!%p13_p4) target bundleno = 2 (0x2), region = 70 }

</bundles_post_ra>
